<compile_context>
chip_gen: v7x
topology: tpu7x:2x2x1
jax: 0.10.0
libtpu: 0.0.40
codegen_flags: <defaults>
</compile_context>

<pallas_src>
import jax
import jax.numpy as jnp
from jax.experimental import pallas as pl
from jax.experimental.pallas import tpu as pltpu

HID2 = 256
HID3 = 128


def _critic_kernel(x_ref, w1s_ref, b1_ref, w2_ref, b2_ref, w3_ref, b3_ref, o_ref):
    # layer 1 + relu  (MXU, bf16 inputs, f32 accumulation; K = state_dim only,
    # the action contribution is already folded into b1_ref).
    h1 = jnp.dot(x_ref[...].astype(jnp.bfloat16), w1s_ref[...],
                 preferred_element_type=jnp.float32)
    h1 = jnp.maximum(h1 + b1_ref[...], 0.0)

    # layer 2 + relu
    h2 = jnp.dot(h1.astype(jnp.bfloat16), w2_ref[...],
                 preferred_element_type=jnp.float32)
    h2 = jnp.maximum(h2 + b2_ref[...], 0.0)

    # layer 3: single output column -> VPU multiply + lane reduce (skip MXU).
    # b3 is an SMEM scalar.
    o = jnp.sum(h2 * w3_ref[...], axis=-1, keepdims=True) + b3_ref[0, 0]
    o_ref[...] = o.astype(o_ref.dtype)


def _round_up(x, m):
    return ((x + m - 1) // m) * m


def _pick_tile(B):
    # Small batch: full-dim block (always legal, grid=(1,)).
    if B < 256:
        return B
    # Mid/large batch: >= 2 grid steps so both v7x TensorCores get work,
    # tile a multiple of 8, capped at 1024 rows.
    return min(_round_up(pl.cdiv(B, 2), 8), 1024)


def critic_forward(critic_x, u, params):
    """critic_x: (B, state_dim) f32; u: (1, action_dim) or (action_dim,) f32.

    Matches PyTorch Critic.forward: u is broadcast (expand) across the batch.
    """
    w1s, w1a, b1, w2, b2, w3, b3 = params
    B, state_dim = critic_x.shape
    action_dim = w1a.shape[0]
    critic_x = critic_x.astype(jnp.float32)
    u2 = jnp.reshape(u, (1, action_dim)).astype(jnp.float32)

    # Hoisted, batch-invariant effective layer-1 bias (tiny XLA dot, done once).
    b1_eff = (
        jnp.dot(u2.astype(jnp.bfloat16), w1a, preferred_element_type=jnp.float32)
        + b1
    )  # (1, HID2) f32

    TB = _pick_tile(B)
    grid = (pl.cdiv(B, TB),)
    const = lambda i: (0, 0)

    flops = 2 * B * (state_dim * HID2 + HID2 * HID3 + HID3)
    bytes_accessed = (
        B * state_dim * 4 + B * 4                       # x in, scores out
        + (state_dim * HID2 + HID2 * HID3) * 2          # bf16 weights
        + (HID2 + HID3 + HID3 + 1) * 4                  # biases, w3 row, b3
    )

    out = pl.pallas_call(
        _critic_kernel,
        out_shape=jax.ShapeDtypeStruct((B, 1), jnp.float32),
        grid=grid,
        in_specs=[
            pl.BlockSpec((TB, state_dim), lambda i: (i, 0)),   # x (tiled on batch)
            pl.BlockSpec((state_dim, HID2), const),            # w1 (state block)
            pl.BlockSpec((1, HID2), const),                    # b1_eff
            pl.BlockSpec((HID2, HID3), const),                 # w2
            pl.BlockSpec((1, HID3), const),                    # b2
            pl.BlockSpec((1, HID3), const),                    # w3 as a row
            pl.BlockSpec(memory_space=pltpu.MemorySpace.SMEM), # b3 scalar
        ],
        out_specs=pl.BlockSpec((TB, 1), lambda i: (i, 0)),
        compiler_params=pltpu.CompilerParams(
            dimension_semantics=("parallel",),                 # v7x: shard over 2 TCs
            vmem_limit_bytes=32 * 1024 * 1024,                 # > v5e 16 MiB default
        ),
        cost_estimate=pl.CostEstimate(
            flops=flops, transcendentals=0, bytes_accessed=bytes_accessed),
    )(critic_x, w1s, b1_eff, w2, b2, w3, b3)
    return out


def init_critic_params(key, state_dim, action_dim, hid2=HID2, hid3=HID3):
    """PyTorch nn.Linear default init (uniform +/- 1/sqrt(fan_in)).
    Layer-1 weight is stored split (state columns / action columns), both with
    the full fan_in = state_dim + action_dim. MXU weights are bf16; biases and
    the layer-3 row stay f32 (layer 3 runs on the VPU)."""
    in_dim = state_dim + action_dim
    ks = jax.random.split(key, 7)

    def _uniform(k, shape, fan_in, dtype):
        bound = 1.0 / jnp.sqrt(fan_in)
        return jax.random.uniform(k, shape, jnp.float32, -bound, bound).astype(dtype)

    w1s = _uniform(ks[0], (state_dim, hid2), in_dim, jnp.bfloat16)
    w1a = _uniform(ks[1], (action_dim, hid2), in_dim, jnp.bfloat16)
    b1 = _uniform(ks[2], (1, hid2), in_dim, jnp.float32)
    w2 = _uniform(ks[3], (hid2, hid3), hid2, jnp.bfloat16)
    b2 = _uniform(ks[4], (1, hid3), hid2, jnp.float32)
    w3 = _uniform(ks[5], (1, hid3), hid3, jnp.float32)
    b3 = _uniform(ks[6], (1, 1), hid3, jnp.float32)
    return (w1s, w1a, b1, w2, b2, w3, b3)


if __name__ == "__main__":
    state_dim, action_dim, batch = 16, 8, 8

    key = jax.random.PRNGKey(0)
    kp, kx, ku = jax.random.split(key, 3)
    params = init_critic_params(kp, state_dim, action_dim)

    critic_x = jax.random.normal(kx, (batch, state_dim), jnp.float32)
    u = jax.random.normal(ku, (1, action_dim), jnp.float32)

    out = critic_forward(critic_x, u, params)
    out = jax.block_until_ready(out)

    # Reference in plain JAX, mirroring the kernel's bf16-input / f32-accumulate math.
    # NOTE: bf16 weights give ~1e-2 rel error vs a pure-f32 PyTorch Critic; fine for RL.
    w1s, w1a, b1, w2, b2, w3, b3 = params
    w1s_f = w1s.astype(jnp.float32)
    w1a_f = w1a.astype(jnp.float32)
    w2_f = w2.astype(jnp.float32)
    xb = critic_x.astype(jnp.bfloat16).astype(jnp.float32)
    ub = u.reshape(1, -1).astype(jnp.bfloat16).astype(jnp.float32)
    b1_eff = ub @ w1a_f + b1
    h1 = jnp.maximum(xb @ w1s_f + b1_eff, 0.0)
    h2 = jnp.maximum(h1.astype(jnp.bfloat16).astype(jnp.float32) @ w2_f + b2, 0.0)
    ref = jnp.sum(h2 * w3, axis=-1, keepdims=True) + b3

    assert out.shape == (batch, 1)
    assert jnp.allclose(out, ref, atol=5e-3, rtol=5e-3), (
        f"max abs diff = {jnp.max(jnp.abs(out - ref))}")
    print("KERNEL_OK")
</pallas_src>

<mosaic_0001>
module attributes {stable_mosaic.version = 11 : i64} {
  func.func @_critic_kernel(%arg0: i32, %arg1: memref<8x16xf32, #tpu.memory_space<vmem>>, %arg2: memref<16x256xbf16, #tpu.memory_space<vmem>>, %arg3: memref<1x256xf32, #tpu.memory_space<vmem>>, %arg4: memref<256x128xbf16, #tpu.memory_space<vmem>>, %arg5: memref<1x128xf32, #tpu.memory_space<vmem>>, %arg6: memref<1x128xf32, #tpu.memory_space<vmem>>, %arg7: memref<1x1xf32, #tpu.memory_space<smem>>, %arg8: memref<8x1xf32, #tpu.memory_space<vmem>>) attributes {dimension_semantics = [#tpu.dimension_semantics<parallel>], iteration_bounds = array<i64: 1>, scalar_prefetch = 0 : i64, scratch_operands = 0 : i64, tpu.core_type = #tpu.core_type<tc>, window_params = [{transform_indices = @transform_0, window_bounds = array<i64: 8, 16>}, {pipeline_mode = #tpu.pipeline_mode<synchronous>, transform_indices = @transform_1, window_bounds = array<i64: 16, 256>}, {pipeline_mode = #tpu.pipeline_mode<synchronous>, transform_indices = @transform_2, window_bounds = array<i64: 1, 256>}, {pipeline_mode = #tpu.pipeline_mode<synchronous>, transform_indices = @transform_3, window_bounds = array<i64: 256, 128>}, {pipeline_mode = #tpu.pipeline_mode<synchronous>, transform_indices = @transform_4, window_bounds = array<i64: 1, 128>}, {pipeline_mode = #tpu.pipeline_mode<synchronous>, transform_indices = @transform_5, window_bounds = array<i64: 1, 128>}, {transform_indices = @transform_6, window_bounds = array<i64: 1, 1>}, {transform_indices = @transform_7, window_bounds = array<i64: 8, 1>}]} {
    %c0 = arith.constant 0 : index
    %c0_0 = arith.constant 0 : index
    %0 = vector.load %arg1[%c0, %c0_0] : memref<8x16xf32, #tpu.memory_space<vmem>>, vector<8x16xf32>
    %1 = arith.truncf %0 : vector<8x16xf32> to vector<8x16xbf16>
    %c0_1 = arith.constant 0 : index
    %c0_2 = arith.constant 0 : index
    %2 = vector.load %arg2[%c0_1, %c0_2] : memref<16x256xbf16, #tpu.memory_space<vmem>>, vector<16x256xbf16>
    %cst = arith.constant dense<0.000000e+00> : vector<8x256xf32>
    %3 = tpu.matmul %1, %2, %cst {dimension_numbers = #tpu.dot_dimension_numbers<[1], [0], [0], [1], [0, 0, 1, 1], [], []>} : vector<8x16xbf16>, vector<16x256xbf16>, vector<8x256xf32> -> vector<8x256xf32>
    %c0_3 = arith.constant 0 : index
    %c0_4 = arith.constant 0 : index
    %4 = vector.load %arg3[%c0_3, %c0_4] : memref<1x256xf32, #tpu.memory_space<vmem>>, vector<1x256xf32>
    %5 = vector.broadcast %4 : vector<1x256xf32> to vector<8x256xf32>
    %6 = arith.addf %3, %5 : vector<8x256xf32>
    %cst_5 = arith.constant 0.000000e+00 : f32
    %7 = vector.broadcast %cst_5 : f32 to vector<8x256xf32>
    %8 = arith.maximumf %6, %7 : vector<8x256xf32>
    %9 = arith.truncf %8 : vector<8x256xf32> to vector<8x256xbf16>
    %c0_6 = arith.constant 0 : index
    %c0_7 = arith.constant 0 : index
    %10 = vector.load %arg4[%c0_6, %c0_7] : memref<256x128xbf16, #tpu.memory_space<vmem>>, vector<256x128xbf16>
    %cst_8 = arith.constant dense<0.000000e+00> : vector<8x128xf32>
    %11 = tpu.matmul %9, %10, %cst_8 {dimension_numbers = #tpu.dot_dimension_numbers<[1], [0], [0], [1], [0, 0, 1, 1], [], []>} : vector<8x256xbf16>, vector<256x128xbf16>, vector<8x128xf32> -> vector<8x128xf32>
    %c0_9 = arith.constant 0 : index
    %c0_10 = arith.constant 0 : index
    %12 = vector.load %arg5[%c0_9, %c0_10] : memref<1x128xf32, #tpu.memory_space<vmem>>, vector<1x128xf32>
    %13 = vector.broadcast %12 : vector<1x128xf32> to vector<8x128xf32>
    %14 = arith.addf %11, %13 : vector<8x128xf32>
    %cst_11 = arith.constant 0.000000e+00 : f32
    %15 = vector.broadcast %cst_11 : f32 to vector<8x128xf32>
    %16 = arith.maximumf %14, %15 : vector<8x128xf32>
    %c0_12 = arith.constant 0 : index
    %c0_13 = arith.constant 0 : index
    %17 = vector.load %arg6[%c0_12, %c0_13] : memref<1x128xf32, #tpu.memory_space<vmem>>, vector<1x128xf32>
    %18 = vector.broadcast %17 : vector<1x128xf32> to vector<8x128xf32>
    %19 = arith.mulf %16, %18 : vector<8x128xf32>
    %cst_14 = arith.constant dense<0.000000e+00> : vector<8xf32>
    %20 = vector.multi_reduction <add>, %19, %cst_14 [1] : vector<8x128xf32> to vector<8xf32>
    %21 = vector.shape_cast %20 : vector<8xf32> to vector<8x1xf32>
    %c0_15 = arith.constant 0 : index
    %c0_16 = arith.constant 0 : index
    %22 = memref.load %arg7[%c0_15, %c0_16] : memref<1x1xf32, #tpu.memory_space<smem>>
    %23 = vector.broadcast %22 : f32 to vector<8x1xf32>
    %24 = arith.addf %21, %23 : vector<8x1xf32>
    %c0_17 = arith.constant 0 : index
    %c0_18 = arith.constant 0 : index
    %25 = vector.load %arg8[%c0_17, %c0_18] : memref<8x1xf32, #tpu.memory_space<vmem>>, vector<8x1xf32>
    tpu.vector_store %arg8[%c0_17, %c0_18], %24 {strides = array<i32>} : memref<8x1xf32, #tpu.memory_space<vmem>>, vector<8x1xf32>,
    return
  }
  func.func @transform_0(%arg0: i32) -> (i32, i32) {
    %c0_i32 = arith.constant 0 : i32
    %c0_i32_0 = arith.constant 0 : i32
    return %arg0, %c0_i32 : i32, i32
  }
  func.func @transform_1(%arg0: i32) -> (i32, i32) {
    %c0_i32 = arith.constant 0 : i32
    %c0_i32_0 = arith.constant 0 : i32
    %c0_i32_1 = arith.constant 0 : i32
    return %c0_i32, %c0_i32_0 : i32, i32
  }
  func.func @transform_2(%arg0: i32) -> (i32, i32) {
    %c0_i32 = arith.constant 0 : i32
    %c0_i32_0 = arith.constant 0 : i32
    %c0_i32_1 = arith.constant 0 : i32
    return %c0_i32, %c0_i32_0 : i32, i32
  }
  func.func @transform_3(%arg0: i32) -> (i32, i32) {
    %c0_i32 = arith.constant 0 : i32
    %c0_i32_0 = arith.constant 0 : i32
    %c0_i32_1 = arith.constant 0 : i32
    return %c0_i32, %c0_i32_0 : i32, i32
  }
  func.func @transform_4(%arg0: i32) -> (i32, i32) {
    %c0_i32 = arith.constant 0 : i32
    %c0_i32_0 = arith.constant 0 : i32
    %c0_i32_1 = arith.constant 0 : i32
    return %c0_i32, %c0_i32_0 : i32, i32
  }
  func.func @transform_5(%arg0: i32) -> (i32, i32) {
    %c0_i32 = arith.constant 0 : i32
    %c0_i32_0 = arith.constant 0 : i32
    %c0_i32_1 = arith.constant 0 : i32
    return %c0_i32, %c0_i32_0 : i32, i32
  }
  func.func @transform_6(%arg0: i32) -> (i32, i32) {
    %c0_i32 = arith.constant 0 : i32
    %c0_i32_0 = arith.constant 0 : i32
    %c0_i32_1 = arith.constant 0 : i32
    return %c0_i32, %c0_i32_0 : i32, i32
  }
  func.func @transform_7(%arg0: i32) -> (i32, i32) {
    %c0_i32 = arith.constant 0 : i32
    %c0_i32_0 = arith.constant 0 : i32
    return %arg0, %c0_i32 : i32, i32
  }
}

</mosaic_0001>

<bundles_post_ra>
// kernel: tpu_custom_call.1
= control target key start
LH: loop header
LB: loop body
LE: loop exit
PB: predicated region body
PF: predicated region fallthrough
CT: control target
= control target key end

     0   :  { %13 = vsyncpa [#allocation4], 0  ;;  %s578_s0 = inlined_call_operand.hbm [shape: f32[8,16], index: 0, kind: input, shape index: {}]   ;;  %s579_s1 = inlined_call_operand.hbm [shape: bf16[16,256], index: 1, kind: input, shape index: {}]   ;;  %s580_s2 = inlined_call_operand.vmem [shape: f32[1,256], index: 2, kind: input, shape index: {}]   ;;  %s581_s3 = inlined_call_operand.hbm [shape: bf16[256,128], index: 3, kind: input, shape index: {}]   ;;  %s582_s4 = inlined_call_operand.vmem [shape: f32[1,128], index: 4, kind: input, shape index: {}]   ;;  %s583_s5 = inlined_call_operand.vmem [shape: f32[1,128], index: 5, kind: input, shape index: {}]   ;;  %s584_s6 = inlined_call_operand.<no memory space> [shape: f32[1,1], index: 6, kind: input, shape index: {}]   ;;  %s585_s7 = inlined_call_operand.vmem [shape: f32[8,1], index: 7, kind: output, shape index: {}]  }
   0x1   :  { %14 = vsyncpa [#allocation6], 0  ;;  %s479_s24 = smov [#allocation5]   ;;  %s409_s28 = scalar_lea.hbm %s579_s1, 256 }
   0x2   :  { %s30_s25 = sshll.u32 %s479_s24, 4  ;;  %p410_p0 = scmp.ne.s32.totalorder %s579_s1, %s409_s28  ;;  %s31_s25 = int_to_ptr.vmem [resolvable:$true] %s30_s25 }
   0x3   :  { %p413_p1 = scmp.lt.u32.totalorder %s409_s28, %s579_s1 }
   0x5   :  { %p415_p2 = pnand %p413_p1, %p410_p0 }
   0x7   :  { %418 = shalt.err (!%p415_p2)
}
   0x8   :  { %s419_s10 = scalar_lea.vmem %s31_s25, 256  ;;  %p424_p4 = scmp.lt.s32.totalorder %s31_s25, %s31_s25 }
   0x9   :  { %p420_p3 = scmp.ne.s32.totalorder %s31_s25, %s419_s10  ;;  %p425_p5 = scmp.lt.s32.totalorder %s419_s10, %s419_s10 }
   0xb   :  { %p426_p6 = por %p425_p5, %p424_p4 }
   0xd   :  { %p427_p7 = pnand %p426_p6, %p420_p3 }
   0xf   :  { %430 = shalt.err (!%p427_p7)
}
  0x10   :  { %s480_s11 = smov 128   ;;  %s481_s12 = smov 8  }
  0x11   :  { %36 = dma.hbm_to_vmem [thread:$0]  %s579_s1, 256, %s31_s25, [#allocation6], %s480_s11, %s480_s11, %s481_s12  }
  0x12   :  { %s482_s15 = smov [#allocation3]   ;;  %s483_s17 = smov [#allocation7]  }
  0x13   :  { %s21_s16 = sshll.u32 %s482_s15, 4  ;;  %s44_s18 = sshll.u32 %s483_s17, 4  ;;  %s22_s16 = int_to_ptr.vmem [resolvable:$true] %s21_s16  ;;  %s45_s18 = int_to_ptr.vmem [resolvable:$true] %s44_s18 }
  0x14   :  { %s431_s21 = scalar_lea.hbm %s578_s0, 128 }
  0x15   :  { %p432_p8 = scmp.ne.s32.totalorder %s578_s0, %s431_s21  ;;  %p435_p9 = scmp.lt.u32.totalorder %s431_s21, %s578_s0 }
  0x17   :  { %p437_p10 = pnand %p435_p9, %p432_p8 }
  0x19   :  { %440 = shalt.err (!%p437_p10)
}
  0x1a   :  { %s441_s1 = scalar_lea.vmem %s22_s16, 128  ;;  %p446_p12 = scmp.lt.s32.totalorder %s22_s16, %s22_s16 }
  0x1b   :  { %p442_p11 = scmp.ne.s32.totalorder %s22_s16, %s441_s1  ;;  %p447_p13 = scmp.lt.s32.totalorder %s441_s1, %s441_s1 }
  0x1d   :  { %p448_p0 = por %p447_p13, %p446_p12 }
  0x1f   :  { %p449_p1 = pnand %p448_p0, %p442_p11 }
  0x21   :  { %452 = shalt.err (!%p449_p1)
}
  0x22   :  { %24 = dma.hbm_to_vmem [thread:$0]  %s578_s0, 128, %s22_s16, [#allocation4]  }
  0x23   :  { %s453_s30 = scalar_lea.hbm %s581_s3, 2048 }
  0x24   :  { %p454_p2 = scmp.ne.s32.totalorder %s581_s3, %s453_s30  ;;  %p457_p3 = scmp.lt.u32.totalorder %s453_s30, %s581_s3 }
  0x26   :  { %p459_p4 = pnand %p457_p3, %p454_p2 }
  0x28   :  { %462 = shalt.err (!%p459_p4)
}
  0x29   :  { %s463_s12 = scalar_lea.vmem %s45_s18, 2048  ;;  %p468_p6 = scmp.lt.s32.totalorder %s45_s18, %s45_s18 }
  0x2a   :  { %p464_p5 = scmp.ne.s32.totalorder %s45_s18, %s463_s12  ;;  %p469_p7 = scmp.lt.s32.totalorder %s463_s12, %s463_s12 }
  0x2c   :  { %p470_p8 = por %p469_p7, %p468_p6 }
  0x2e   :  { %p471_p9 = pnand %p470_p8, %p464_p5 }
  0x30   :  { %474 = shalt.err (!%p471_p9)
}
  0x31   :  { %s484_s0 = smov 64   ;;  %s485_s13 = smov 4  }
  0x32   :  { %50 = dma.hbm_to_vmem [thread:$0]  %s581_s3, 2048, %s45_s18, [#allocation6], %s484_s0, %s484_s0, %s485_s13  }
  0x33   :  { %475 = dma.done.wait [#allocation4], 128  }
  0x34   :  { %476 = vsyncadd [#allocation4], 4294967168 }
  0x35   :  { %477 = dma.done.wait [#allocation6], 2304  }
  0x36   :  { %478 = vsyncadd [#allocation6], 4294964992  ;;  %v486_v0 = vmov 0   ;;  %v390_v1 = vld [vmem:[#allocation5 + $0x4] ss:$8 sps:$4 sm:$0xff]   ;;  %v67_v3 = vld [vmem:[#allocation3] sm:$0xff]  ;;  %v73_v21 = vlaneseq  ;;  %v329_v48 = vstv %s584_s6 }
  0x37   :  { %129 = vmatprep.mubr.bf16.mxu0 %v486_v0  ;;  %v392_v2 = vld [vmem:[#allocation5] ss:$8 sps:$4 sm:$0xff]   ;;  %97 = vmatprep.subr.bf16.mxu0 %v390_v1  ;;  %v68_v4 = vpack.c.bf16 %v67_v3, %v67_v3  ;;  %v393_v5 = vld [vmem:[#allocation7 + $0x40] sm:$0xff]   ;;  %vm93_vm0 = vcmask 130048   ;;  %v395_v7 = vld [vmem:[#allocation7 + $0x48] sm:$0xff]   ;;  %vm331_vm1 = vcmask 7168  }
  0x38   :  { %98 = vmatpush1.bf16.msra.mxu0 %v392_v2  ;;  %v394_v6 = vld [vmem:[#allocation7] sm:$0xff]   ;;  %360 = vmatprep.subr.bf16.mxu1 %v393_v5  ;;  %v396_v8 = vld [vmem:[#allocation7 + $0x8] sm:$0xff]   ;;  %v397_v9 = vld [vmem:[#allocation7 + $0x50] sm:$0xff]   ;;  %v74_v22 = vshrl.u32 %v73_v21, 7 }
  0x39   :  { %361 = vmatpush3.bf16.msra.mxu1 %v394_v6  ;;  %v398_v10 = vld [vmem:[#allocation7 + $0x10] sm:$0xff]   ;;  %v399_v11 = vld [vmem:[#allocation7 + $0x58] sm:$0xff]   ;;  %v401_v13 = vld [vmem:[#allocation7 + $0x60] sm:$0xff]  }
  0x3a   :  { %362 = vmatprep.subr.bf16.mxu1 %v395_v7  ;;  %v400_v12 = vld [vmem:[#allocation7 + $0x18] sm:$0xff]   ;;  %v402_v14 = vld [vmem:[#allocation7 + $0x20] sm:$0xff]   ;;  %v403_v15 = vld [vmem:[#allocation7 + $0x68] sm:$0xff]   ;;  %v75_v23 = vsub.s32 0, %v74_v22  ;;  %v79_v25 = vsub.s32 1, %v74_v22 }
  0x3b   :  { %341 = vmatmul.mubr.msk.bf16.vlgmr.msra.gmra.mrb[0].mxu0 %vm93_vm0, %v68_v4  ;;  %v404_v16 = vld [vmem:[#allocation7 + $0x28] sm:$0xff]   ;;  %v405_v17 = vld [vmem:[#allocation7 + $0x70] sm:$0xff]   ;;  %v407_v19 = vld [vmem:[#allocation7 + $0x78] sm:$0xff]  }
  0x3c   :  { %v406_v18 = vld [vmem:[#allocation7 + $0x30] sm:$0xff]   ;;  %v408_v20 = vld [vmem:[#allocation7 + $0x38] sm:$0xff]   ;;  %v71_v24 = vld [vmem:[%s580_s2] sm:$0x3] }
  0x3d   :  { %363 = vmatpush3.bf16.msra.mxu1 %v396_v8  ;;  %v76_v26 = vrot.slane %v71_v24, %v75_v23  ;;  %v80_v27 = vrot.slane %v71_v24, %v79_v25  ;;  %v342_v40 = vld [vmem:[%s582_s4] ss:$0 sm:$0xff] }
  0x3e   :  { %364 = vmatprep.subr.bf16.mxu1 %v397_v9  ;;  %v359_v45 = vld [vmem:[%s583_s5] ss:$0 sm:$0xff] }
  0x41   :  { %365 = vmatpush3.bf16.msra.mxu1 %v398_v10 }
  0x42   :  { %366 = vmatprep.subr.bf16.mxu1 %v399_v11 }
  0x45   :  { %367 = vmatpush3.bf16.msra.mxu1 %v400_v12 }
  0x46   :  { %368 = vmatprep.subr.bf16.mxu1 %v401_v13 }
  0x49   :  { %369 = vmatpush3.bf16.msra.mxu1 %v402_v14 }
  0x4a   :  { %370 = vmatprep.subr.bf16.mxu1 %v403_v15 }
  0x4d   :  { %371 = vmatpush3.bf16.msra.mxu1 %v404_v16 }
  0x4e   :  { %372 = vmatprep.subr.bf16.mxu1 %v405_v17 }
  0x51   :  { %373 = vmatpush3.bf16.msra.mxu1 %v406_v18 }
  0x52   :  { %374 = vmatprep.subr.bf16.mxu1 %v407_v19 }
  0x55   :  { %375 = vmatpush3.bf16.msra.mxu1 %v408_v20 }
 0x10e   :  { %v131_v28 = vpop.f32.mrb[0].mxu0 }
 0x10f   :  { %v132_v29 = vadd.f32 %v131_v28, %v76_v26  ;;  %v133_v30 = vpop.f32.mrb[1].mxu0 }
 0x110   :  { %v134_v31 = vadd.f32 %v133_v30, %v80_v27  ;;  %v135_v32 = vpop.f32.mrb[2].mxu0 }
 0x111   :  { %v138_v33 = vmax.f32 %v132_v29, 0.0  ;;  %v136_v34 = vpop.f32.mrb[3].mxu0 }
 0x112   :  { %v139_v35 = vmax.f32 %v134_v31, 0.0 }
 0x113   :  { %v140_v37 = vpack.c.bf16 %v138_v33, %v138_v33 }
 0x114   :  { %v141_v36 = vpack.c.bf16 %v139_v35, %v139_v35 }
 0x116   :  { %309 = vmatprep.mubr.bf16.mxu1 %v141_v36 }
 0x117   :  { %310 = vmatmul.mubr.bf16.vlgmr.msra.gmra.mrb[0].mxu1 %v140_v37 }
 0x1ea   :  { %v376_v38 = vpop.f32.mrb[0].mxu1 }
 0x1eb   :  { %v377_v39 = vpop.f32.mrb[1].mxu1 }
 0x1ec   :  { %v378_v41 = vadd.f32 %v377_v39, %v376_v38  ;;  %v379_v42 = vpop.f32.mrb[2].mxu1 }
 0x1ed   :  { %v380_v43 = vpop.f32.mrb[3].mxu1 }
 0x1ee   :  { %v312_v44 = vadd.f32 %v378_v41, %v342_v40 }
 0x1f0   :  { %v317_v46 = vmax.f32 %v312_v44, 0.0 }
 0x1f2   :  { %v325_v47 = vmul.f32 %v359_v45, %v317_v46 }
 0x1f4   :  { %326 = vadd.xlane.f32.xlu0 %v325_v47 }
 0x281   :  { %v327_v49 = vpop.xlane.xlu0 %326 }
 0x282   :  { %v330_v50 = vadd.f32 %v329_v48, %v327_v49 }
 0x284   :  { %332 = vst.msk [vmem:[%s585_s7] sm:$0xff] %vm331_vm1, %v330_v50 }
 0x285   :  { %337 = vsyncpa [#allocation4], 1 }
 0x286   :  { %338 = vsyncpa [#allocation6], 1 }

</bundles_post_ra>
